<compile_context>
chip_gen: v7x
topology: tpu7x:2x2x1
jax: 0.10.0
libtpu: 0.0.40
codegen_flags: <defaults>
</compile_context>

<pallas_src>
import functools

import jax
import jax.numpy as jnp
from jax import lax
from jax.experimental import pallas as pl
from jax.experimental.pallas import tpu as pltpu


def _round_down(x, m):
    return (x // m) * m


def _round_up(x, m):
    return ((x + m - 1) // m) * m


def _device_profile():
    """Per-generation tuning knobs with safe fallbacks for unknown devices."""
    kind = ""
    try:
        kind = jax.devices()[0].device_kind.lower()
    except Exception:
        pass
    # Dual-TensorCore parts benefit from a 2-way 'parallel' grid axis; v5e/v6e
    # have a single TC where the split only adds a wasted duplicate tile.
    num_cores = 2 if any(s in kind for s in ("v7", "v5p", "v4")) else 1
    # v7x: 64 MiB VMEM per TC -> keep the scoped limit at 32 MiB and a smaller
    # live budget; 128 MiB parts (v5e/v6e/...) take 64 MiB + bigger tiles.
    small_vmem = ("v7" in kind) or (kind == "")
    vmem_limit_bytes = (32 if small_vmem else 64) * 1024 * 1024
    live_vmem_budget = (20 if small_vmem else 44) * 1024 * 1024
    return num_cores, live_vmem_budget, vmem_limit_bytes


def _choose_tb(n_rows, n_cols, pred_itemsize, tgt_itemsize, row_align, live_budget):
    """Row-tile size: as big as the live-VMEM budget allows (no artificial cap).

    Accounts for: 2 inputs x 2 pipeline buffers at input precision, the VMEM
    lane dimension padding to 128 for small C, and ~6 full-tile f32 temporaries
    the kernel materializes (x/t casts, shifted logits, exp, log_softmax, t*lsm).
    """
    lanes = _round_up(max(n_cols, 128), 128)
    bytes_per_row = lanes * (2 * (pred_itemsize + tgt_itemsize) + 6 * 4)
    tb = _round_down(live_budget // max(1, bytes_per_row), row_align)
    tb = min(tb, _round_up(n_rows, row_align))
    return max(tb, row_align)


def _wce_kernel(pred_ref, tgt_ref, o_ref, *, tb, n_rows, mask_tgt, mask_pred):
    """One grid step: a (tb, C) row tile. Accumulates the per-class partial
    sum_i target[i, c] * log_softmax(predict)[i, c] into the per-core
    (1, 1, C) output block (resident across the 'arbitrary' j axis)."""
    j = pl.program_id(1)

    @pl.when(j == 0)
    def _init():
        o_ref[...] = jnp.zeros_like(o_ref)

    x = pred_ref[...].astype(jnp.float32)            # (tb, C)
    t = tgt_ref[...].astype(jnp.float32)             # (tb, C)

    if mask_tgt:
        # Logical (unwrapped) block handled by this step; rows >= n_rows are
        # padding / duplicated blocks and must contribute exactly zero.
        blk = pl.program_id(0) * pl.num_programs(1) + j
        rows = blk * tb + lax.broadcasted_iota(jnp.int32, (tb, 1), 0)
        valid = rows < n_rows                        # (tb, 1) -> broadcast over C
        if mask_pred:
            # Only a ragged tail block can read junk (possibly NaN/Inf) past the
            # array end; wrapped blocks re-read real finite rows, so masking the
            # target alone is sufficient there.
            x = jnp.where(valid, x, 0.0)
        t = jnp.where(valid, t, 0.0)

    # Numerically stable log-softmax over the class (lane) axis.
    m = jnp.max(x, axis=1, keepdims=True)            # (tb, 1)
    sh = x - m
    lse = jnp.log(jnp.sum(jnp.exp(sh), axis=1, keepdims=True))
    log_sm = sh - lse                                # (tb, C)

    # Sublane (row) reduce only; keep lanes (classes) vectorized.
    partial = jnp.sum(t * log_sm, axis=0, keepdims=True)   # (1, C)
    o_ref[...] += partial[None]                      # (1, 1, C) accumulator


def weight_cross_entropy_loss(predict, target, weight, *, reduction="mean",
                              tb=None, num_cores=None):
    """predict, target: (N, C); weight: (C,) or (1, C). Returns scalar f32."""
    if reduction not in ("mean", "sum"):
        raise ValueError(
            "reduction='none' is not supported by this scalar-output kernel; "
            "use 'mean' or 'sum'.")
    n, c = predict.shape
    assert target.shape == (n, c), "predict/target shape mismatch"

    dev_cores, live_budget, vmem_limit = _device_profile()
    if num_cores is None:
        num_cores = dev_cores

    p_isz = jnp.dtype(predict.dtype).itemsize
    t_isz = jnp.dtype(target.dtype).itemsize
    # bf16/f16 tiles pack 16 rows per sublane group; keep f32 at 8.
    row_align = 16 if min(p_isz, t_isz) < 4 else 8

    # Tiny-batch guard: pad with zero rows (zero target rows contribute 0).
    if n < row_align:
        pad = row_align - n
        predict = jnp.pad(predict, ((0, pad), (0, 0)))
        target = jnp.pad(target, ((0, pad), (0, 0)))
    n_pad = predict.shape[0]

    if tb is None:
        tb = _choose_tb(n_pad, c, p_isz, t_isz, row_align, live_budget)
        rebalance = True
    else:
        tb = max(row_align, _round_up(int(tb), row_align))
        rebalance = False

    num_blocks = pl.cdiv(n_pad, tb)
    p_dim = max(1, min(int(num_cores), num_blocks))   # don't over-split tiny inputs
    j_dim = pl.cdiv(num_blocks, p_dim)
    if rebalance:
        # Spread rows evenly over the p_dim*j_dim grid: balances the two v7x
        # TensorCores and removes duplicated wrapped tail blocks in the common
        # case (recomputed tb never exceeds the VMEM-budgeted one).
        tb = max(row_align, _round_up(pl.cdiv(n_pad, p_dim * j_dim), row_align))
        num_blocks = pl.cdiv(n_pad, tb)

    extra_blocks = p_dim * j_dim - num_blocks          # duplicated (wrapped) steps
    tail_partial = (n_pad % tb) != 0                   # last block reads past the end
    mask_tgt = bool(extra_blocks or tail_partial)
    mask_pred = bool(tail_partial)

    def row_block(p, j):
        blk = p * j_dim + j
        if extra_blocks:
            blk = blk % num_blocks   # wrap to a valid full block; target is masked to 0
        return (blk, 0)

    kernel = functools.partial(_wce_kernel, tb=tb, n_rows=n,
                               mask_tgt=mask_tgt, mask_pred=mask_pred)

    partials = pl.pallas_call(
        kernel,
        out_shape=jax.ShapeDtypeStruct((p_dim, 1, c), jnp.float32),
        grid_spec=pltpu.PrefetchScalarGridSpec(
            num_scalar_prefetch=0,
            grid=(p_dim, j_dim),
            in_specs=[
                pl.BlockSpec((tb, c), row_block),    # predict row tile
                pl.BlockSpec((tb, c), row_block),    # target row tile
            ],
            # Per-core accumulator: same output block across the j (reduction) axis.
            out_specs=pl.BlockSpec((1, 1, c), lambda p, j: (p, 0, 0)),
        ),
        compiler_params=pltpu.CompilerParams(
            dimension_semantics=("parallel", "arbitrary"),
            vmem_limit_bytes=vmem_limit,
        ),
    )(predict, target)

    # Tiny epilogue: apply per-class weight once, reduce, negate, scale by 1/N.
    w = jnp.asarray(weight, jnp.float32).reshape(1, 1, c)
    total = -jnp.sum(partials * w)
    if reduction == "mean":
        # NOTE: mean over rows, exactly matching the PyTorch module above
        # (NOT torch.nn.CrossEntropyLoss's weighted normalization).
        total = total / jnp.float32(n)
    return total


def _reference(predict, target, weight, reduction="mean"):
    x = predict.astype(jnp.float32)
    log_sm = jax.nn.log_softmax(x, axis=1)
    w = jnp.asarray(weight, jnp.float32).reshape(1, -1)
    per_row = -jnp.sum(target.astype(jnp.float32) * (w * log_sm), axis=1)
    if reduction == "mean":
        return jnp.mean(per_row)
    elif reduction == "sum":
        return jnp.sum(per_row)
    return per_row


def _check(predict, target, weight, reduction="mean", tb=None, num_cores=None):
    loss = weight_cross_entropy_loss(predict, target, weight,
                                     reduction=reduction, tb=tb,
                                     num_cores=num_cores)
    loss = jax.block_until_ready(loss)
    ref = _reference(predict, target, weight, reduction=reduction)
    if not jnp.allclose(loss, ref, atol=1e-5, rtol=1e-5):
        raise AssertionError(
            f"mismatch (reduction={reduction}, tb={tb}): pallas={loss} ref={ref}")


if __name__ == "__main__":
    key = jax.random.PRNGKey(0)
    k1, k2, k3 = jax.random.split(key, 3)

    def make_inputs(n, c, dtype=jnp.float32):
        predict = jax.random.normal(k1, (n, c), dtype=jnp.float32).astype(dtype)
        # soft targets: rows sum to 1
        target = jax.nn.softmax(
            jax.random.normal(k2, (n, c), dtype=jnp.float32) * 3.0,
            axis=1).astype(dtype)
        weight = 0.5 + jax.random.uniform(k3, (c,), dtype=jnp.float32)
        return predict, target, weight

    # 1) Primary small-shape case (batch=16, classes=32), auto tile size.
    p16, t16, w32 = make_inputs(16, 32)
    _check(p16, t16, w32, reduction="mean")
    _check(p16, t16, w32, reduction="sum")

    # 2) Two aligned row blocks -> exercises the ("parallel", ...) core split.
    p32, t32, w32b = make_inputs(32, 32)
    _check(p32, t32, w32b, reduction="mean", tb=16, num_cores=2)

    # 3) Ragged batch (N=20, tb=8) -> row masking + wrapped duplicate block.
    p20, t20, w32c = make_inputs(20, 32)
    _check(p20, t20, w32c, reduction="mean", tb=8, num_cores=2)

    # 4) Ragged batch, auto tile path (tail-only masking, no wrapping).
    p100, t100, w64 = make_inputs(100, 64)
    _check(p100, t100, w64, reduction="mean")

    # 5) bf16 inputs (halved HBM traffic; 16-row sublane alignment; f32 math).
    pb, tb_, wb = make_inputs(48, 32, dtype=jnp.bfloat16)
    _check(pb, tb_, wb, reduction="mean")

    # 6) C = 128 (full lane utilization), single auto-sized block.
    p256, t256, w128 = make_inputs(256, 128)
    _check(p256, t256, w128, reduction="sum")

    print("KERNEL_OK")
</pallas_src>

<mosaic_0001>
module attributes {stable_mosaic.version = 11 : i64} {
  func.func @_wce_kernel(%arg0: i32, %arg1: i32, %arg2: memref<16x32xf32, #tpu.memory_space<vmem>>, %arg3: memref<16x32xf32, #tpu.memory_space<vmem>>, %arg4: memref<1x1x32xf32, #tpu.memory_space<vmem>>) attributes {dimension_semantics = [#tpu.dimension_semantics<parallel>, #tpu.dimension_semantics<arbitrary>], iteration_bounds = array<i64: 1, 1>, scalar_prefetch = 0 : i64, scratch_operands = 0 : i64, tpu.core_type = #tpu.core_type<tc>, window_params = [{transform_indices = @transform_0, window_bounds = array<i64: 16, 32>}, {transform_indices = @transform_1, window_bounds = array<i64: 16, 32>}, {transform_indices = @transform_2, window_bounds = array<i64: 1, 1, 32>}]} {
    %c0_i32 = arith.constant 0 : i32
    %0 = arith.cmpi eq, %arg1, %c0_i32 : i32
    %1 = arith.extui %0 : i1 to i32
    %c0_i32_0 = arith.constant 0 : i32
    %2 = arith.cmpi ne, %1, %c0_i32_0 : i32
    scf.if %2 {
      %cst_12 = arith.constant 0.000000e+00 : f32
      %22 = vector.broadcast %cst_12 : f32 to vector<1x1x32xf32>
      %c0_13 = arith.constant 0 : index
      %c0_14 = arith.constant 0 : index
      %c0_15 = arith.constant 0 : index
      %23 = vector.load %arg4[%c0_13, %c0_14, %c0_15] : memref<1x1x32xf32, #tpu.memory_space<vmem>>, vector<1x1x32xf32>
      tpu.vector_store %arg4[%c0_13, %c0_14, %c0_15], %22 {strides = array<i32>} : memref<1x1x32xf32, #tpu.memory_space<vmem>>, vector<1x1x32xf32>,
    } else {
    }
    %c0 = arith.constant 0 : index
    %c0_1 = arith.constant 0 : index
    %3 = vector.load %arg2[%c0, %c0_1] : memref<16x32xf32, #tpu.memory_space<vmem>>, vector<16x32xf32>
    %c0_2 = arith.constant 0 : index
    %c0_3 = arith.constant 0 : index
    %4 = vector.load %arg3[%c0_2, %c0_3] : memref<16x32xf32, #tpu.memory_space<vmem>>, vector<16x32xf32>
    %cst = arith.constant dense<0xFF800000> : vector<16xf32>
    %5 = vector.multi_reduction <maximumf>, %3, %cst [1] : vector<16x32xf32> to vector<16xf32>
    %6 = vector.shape_cast %5 : vector<16xf32> to vector<16x1xf32>
    %7 = vector.broadcast %6 : vector<16x1xf32> to vector<16x32xf32>
    %8 = arith.subf %3, %7 : vector<16x32xf32>
    %9 = math.exp %8 : vector<16x32xf32>
    %cst_4 = arith.constant dense<0.000000e+00> : vector<16xf32>
    %10 = vector.multi_reduction <add>, %9, %cst_4 [1] : vector<16x32xf32> to vector<16xf32>
    %11 = vector.shape_cast %10 : vector<16xf32> to vector<16x1xf32>
    %12 = math.log %11 : vector<16x1xf32>
    %13 = vector.broadcast %12 : vector<16x1xf32> to vector<16x32xf32>
    %14 = arith.subf %8, %13 : vector<16x32xf32>
    %15 = arith.mulf %4, %14 : vector<16x32xf32>
    %cst_5 = arith.constant dense<0.000000e+00> : vector<32xf32>
    %16 = vector.multi_reduction <add>, %15, %cst_5 [0] : vector<16x32xf32> to vector<32xf32>
    %17 = vector.shape_cast %16 : vector<32xf32> to vector<1x32xf32>
    %c0_6 = arith.constant 0 : index
    %c0_7 = arith.constant 0 : index
    %c0_8 = arith.constant 0 : index
    %18 = vector.load %arg4[%c0_6, %c0_7, %c0_8] : memref<1x1x32xf32, #tpu.memory_space<vmem>>, vector<1x1x32xf32>
    %19 = vector.shape_cast %17 : vector<1x32xf32> to vector<1x1x32xf32>
    %20 = arith.addf %18, %19 : vector<1x1x32xf32>
    %c0_9 = arith.constant 0 : index
    %c0_10 = arith.constant 0 : index
    %c0_11 = arith.constant 0 : index
    %21 = vector.load %arg4[%c0_9, %c0_10, %c0_11] : memref<1x1x32xf32, #tpu.memory_space<vmem>>, vector<1x1x32xf32>
    tpu.vector_store %arg4[%c0_9, %c0_10, %c0_11], %20 {strides = array<i32>} : memref<1x1x32xf32, #tpu.memory_space<vmem>>, vector<1x1x32xf32>,
    return
  }
  func.func @transform_0(%arg0: i32, %arg1: i32) -> (i32, i32) {
    %c1_i32 = arith.constant 1 : i32
    %0 = arith.muli %arg0, %c1_i32 : i32
    %1 = arith.addi %0, %arg1 : i32
    %c0_i32 = arith.constant 0 : i32
    %c0_i32_0 = arith.constant 0 : i32
    return %1, %c0_i32 : i32, i32
  }
  func.func @transform_1(%arg0: i32, %arg1: i32) -> (i32, i32) {
    %c1_i32 = arith.constant 1 : i32
    %0 = arith.muli %arg0, %c1_i32 : i32
    %1 = arith.addi %0, %arg1 : i32
    %c0_i32 = arith.constant 0 : i32
    %c0_i32_0 = arith.constant 0 : i32
    return %1, %c0_i32 : i32, i32
  }
  func.func @transform_2(%arg0: i32, %arg1: i32) -> (i32, i32, i32) {
    %c0_i32 = arith.constant 0 : i32
    %c0_i32_0 = arith.constant 0 : i32
    %c0_i32_1 = arith.constant 0 : i32
    return %arg0, %c0_i32, %c0_i32_0 : i32, i32, i32
  }
}

</mosaic_0001>

<bundles_post_ra>
// kernel: tpu_custom_call.1
= control target key start
LH: loop header
LB: loop body
LE: loop exit
PB: predicated region body
PF: predicated region fallthrough
CT: control target
= control target key end

     0   :  { %7 = vsyncpa [#allocation3], 0  ;;  %s269_s0 = inlined_call_operand.hbm [shape: f32[16,32], index: 0, kind: input, shape index: {}]   ;;  %s270_s1 = inlined_call_operand.hbm [shape: f32[16,32], index: 1, kind: input, shape index: {}]   ;;  %s271_s2 = inlined_call_operand.hbm [shape: f32[1,1,32], index: 2, kind: output, shape index: {}]  }
   0x1   :  { %8 = vsyncpa [#allocation6], 0 }
   0x2   :  { %9 = vsyncpa [#allocation4], 0  ;;  %s204_s9 = smov [#allocation2]   ;;  %s132_s13 = scalar_lea.hbm %s269_s0, 256 }
   0x3   :  { %s19_s10 = sshll.u32 %s204_s9, 4  ;;  %p133_p0 = scmp.ne.s32.totalorder %s269_s0, %s132_s13  ;;  %s20_s10 = int_to_ptr.vmem [resolvable:$true] %s19_s10 }
   0x4   :  { %p136_p1 = scmp.lt.u32.totalorder %s132_s13, %s269_s0 }
   0x6   :  { %p138_p2 = pnand %p136_p1, %p133_p0 }
   0x8   :  { %141 = shalt.err (!%p138_p2)
}
   0x9   :  { %s142_s18 = scalar_lea.vmem %s20_s10, 256  ;;  %p147_p4 = scmp.lt.s32.totalorder %s20_s10, %s20_s10 }
   0xa   :  { %p143_p3 = scmp.ne.s32.totalorder %s20_s10, %s142_s18  ;;  %p148_p5 = scmp.lt.s32.totalorder %s142_s18, %s142_s18 }
   0xc   :  { %p149_p6 = por %p148_p5, %p147_p4 }
   0xe   :  { %p150_p7 = pnand %p149_p6, %p143_p3 }
  0x10   :  { %153 = shalt.err (!%p150_p7)
}
  0x11   :  { %s205_s19 = smov 128   ;;  %s206_s20 = smov 8  }
  0x12   :  { %25 = dma.hbm_to_vmem [thread:$0]  %s269_s0, 256, %s20_s10, [#allocation3], %s205_s19, %s205_s19, %s206_s20  }
  0x13   :  { %s207_s23 = smov [#allocation5]   ;;  %s154_s27 = scalar_lea.hbm %s270_s1, 256 }
  0x14   :  { %s35_s24 = sshll.u32 %s207_s23, 4  ;;  %p155_p8 = scmp.ne.s32.totalorder %s270_s1, %s154_s27  ;;  %s36_s24 = int_to_ptr.vmem [resolvable:$true] %s35_s24 }
  0x15   :  { %p158_p9 = scmp.lt.u32.totalorder %s154_s27, %s270_s1 }
  0x17   :  { %p160_p10 = pnand %p158_p9, %p155_p8 }
  0x19   :  { %163 = shalt.err (!%p160_p10)
}
  0x1a   :  { %s164_s4 = scalar_lea.vmem %s36_s24, 256  ;;  %p169_p12 = scmp.lt.s32.totalorder %s36_s24, %s36_s24 }
  0x1b   :  { %p165_p11 = scmp.ne.s32.totalorder %s36_s24, %s164_s4  ;;  %p170_p13 = scmp.lt.s32.totalorder %s164_s4, %s164_s4 }
  0x1d   :  { %p171_p0 = por %p170_p13, %p169_p12 }
  0x1f   :  { %p172_p1 = pnand %p171_p0, %p165_p11 }
  0x21   :  { %175 = shalt.err (!%p172_p1)
}
  0x22   :  { %41 = dma.hbm_to_vmem [thread:$0]  %s270_s1, 256, %s36_s24, [#allocation6], %s205_s19, %s205_s19, %s206_s20  }
  0x23   :  { %198 = dma.done.wait [#allocation3], 256  }
  0x24   :  { %199 = vsyncadd [#allocation3], 4294967040 }
  0x25   :  { %200 = dma.done.wait [#allocation6], 256  }
  0x26   :  { %201 = vsyncadd [#allocation6], 4294967040  ;;  %vm62_vm0 = vcmask 261120   ;;  %v58_v0 = vld [vmem:[#allocation2] sm:$0xff]  ;;  %v59_v1 = vld [vmem:[#allocation2 + $0x8] sm:$0xff]  ;;  %vm56_vm1 = vcmask 253952  }
  0x27   :  { %v63_v2 = vsel %vm62_vm0, %v58_v0, -inf  ;;  %v66_v3 = vsel %vm62_vm0, %v59_v1, -inf  ;;  %v208_v14 = vmov 0.0   ;;  %v60_v21 = vld [vmem:[#allocation5] sm:$0xff]  ;;  %v61_v23 = vld [vmem:[#allocation5 + $0x8] sm:$0xff]  ;;  %s209_s1 = smov [#allocation7]  }
  0x28   :  { %64 = vmax.xlane.f32.xlu0 %v63_v2  ;;  %57 = vst.msk [vmem:[#allocation7] sm:$0x1] %vm56_vm1, %v208_v14  ;;  %s108_s6 = sshll.u32 %s209_s1, 4  ;;  %s109_s6 = int_to_ptr.vmem [resolvable:$true] %s108_s6 }
  0x29   :  { %s176_s7 = scalar_lea.vmem %s109_s6, 16  ;;  %s180_s8 = scalar_lea.vmem %s109_s6, 32 }
  0x2a   :  { %p177_p2 = scmp.ne.s32.totalorder %s109_s6, %s176_s7  ;;  %p181_p3 = scmp.lt.s32.totalorder %s109_s6, %s109_s6 }
  0x2b   :  { %p182_p4 = scmp.lt.s32.totalorder %s180_s8, %s176_s7 }
  0x2c   :  { %67 = vmax.xlane.f32.xlu0 %v66_v3 }
  0x2d   :  { %p183_p5 = por %p182_p4, %p181_p3 }
  0x2f   :  { %v98_v35 = vld [vmem:[#allocation7] sm:$0x1]  ;;  %p184_p6 = pnand %p183_p5, %p177_p2 }
  0xb5   :  { %v65_v4 = vpop.xlane.xlu0 %64 }
  0xb6   :  { %v69_v5 = vsub.f32 %v58_v0, %v65_v4 }
  0xb8   :  { %v71_v6 = vmul.f32 1.442695, %v69_v5 }
  0xb9   :  { %v68_v7 = vpop.xlane.xlu0 %67 }
  0xba   :  { %124 = vpow2.f32 %v71_v6  ;;  %v70_v8 = vsub.f32 %v59_v1, %v68_v7 }
  0xbc   :  { %v73_v9 = vmul.f32 1.442695, %v70_v8 }
  0xbe   :  { %126 = vpow2.f32 %v73_v9 }
  0xc4   :  { %v125_v10 = vpop.eup %124 }
  0xc5   :  { %v75_v11 = vsel %vm62_vm0, %v125_v10, 0.0 }
  0xc6   :  { %76 = vadd.xlane.f32.xlu1 %v75_v11 }
  0xc8   :  { %v127_v12 = vpop.eup %126 }
  0xc9   :  { %v78_v13 = vsel %vm62_vm0, %v127_v12, 0.0 }
  0xca   :  { %79 = vadd.xlane.f32.xlu1 %v78_v13 }
 0x153   :  { %v77_v15 = vpop.xlane.xlu1 %76 }
 0x154   :  { %128 = vlog2.f32 %v77_v15 }
 0x157   :  { %v80_v16 = vpop.xlane.xlu1 %79 }
 0x158   :  { %130 = vlog2.f32 %v80_v16 }
 0x15e   :  { %v129_v17 = vpop.eup %128 }
 0x15f   :  { %v82_v18 = vmul.f32 0.6931472, %v129_v17 }
 0x161   :  { %v85_v19 = vsub.f32 %v69_v5, %v82_v18 }
 0x162   :  { %v131_v20 = vpop.eup %130 }
 0x163   :  { %v84_v22 = vmul.f32 0.6931472, %v131_v20  ;;  %v87_v24 = vmul.f32 %v85_v19, %v60_v21 }
 0x165   :  { %v86_v25 = vsub.f32 %v70_v8, %v84_v22  ;;  %v89_v27 = vsel %vm62_vm0, %v87_v24, 0.0 }
 0x167   :  { %v88_v26 = vmul.f32 %v86_v25, %v61_v23 }
 0x169   :  { %v90_v28 = vsel %vm62_vm0, %v88_v26, 0.0 }
 0x16a   :  { %v91_v29 = vadd.f32 %v90_v28, %v89_v27 }
 0x16c   :  { %v92_v30 = vrot.slane %v91_v29, 4 }
 0x16e   :  { %v93_v31 = vadd.f32 %v92_v30, %v91_v29 }
 0x170   :  { %v94_v32 = vrot.slane %v93_v31, 2 }
 0x172   :  { %v95_v33 = vadd.f32 %v94_v32, %v93_v31 }
 0x174   :  { %v96_v34 = vrot.slane %v95_v33, 1 }
 0x176   :  { %v97_v36 = vadd.f32 %v96_v34, %v95_v33 }
 0x178   :  { %v99_v37 = vadd.f32 %v98_v35, %v97_v36 }
 0x17a   :  { %101 = vst.msk [vmem:[#allocation7] sm:$0x1] %vm56_vm1, %v99_v37 }
 0x17b   :  { %187 = shalt.err (!%p184_p6)
}
 0x17c   :  { %s188_s11 = scalar_lea.hbm %s271_s2, 16 }
 0x17d   :  { %p189_p7 = scmp.ne.s32.totalorder %s271_s2, %s188_s11  ;;  %p192_p8 = scmp.lt.u32.totalorder %s188_s11, %s271_s2 }
 0x17f   :  { %p194_p9 = pnand %p192_p8, %p189_p7 }
 0x181   :  { %197 = shalt.err (!%p194_p9)
}
 0x182   :  { %111 = dma.vmem_to_hbm [thread:$0]  %s109_s6, 16, %s271_s2, [#allocation4]  }
 0x183   :  { %202 = dma.done.wait [#allocation4], 16  }
 0x184   :  { %203 = vsyncadd [#allocation4], 4294967280 }
 0x185   :  { %115 = vsyncpa [#allocation3], 1 }
 0x186   :  { %116 = vsyncpa [#allocation6], 1 }
 0x187   :  { %117 = vsyncpa [#allocation4], 1 }

</bundles_post_ra>
